<compile_context>
chip_gen: v7x
topology: tpu7x:2x2x1
jax: 0.10.0
libtpu: 0.0.40
codegen_flags: <defaults>
</compile_context>

<pallas_src>
import jax
import jax.numpy as jnp
from jax.experimental import pallas as pl
from jax.experimental.pallas import tpu as pltpu


F32 = jnp.float32
BF16 = jnp.bfloat16


# ----------------------------------------------------------------------------
# Kernel 1: encoder — per row-tile:
#   hidden = relu(adj_tile @ H0)                (H0 = cat(X,Y) @ W0, hoisted)
#   hml    = hidden @ [Wm|Wl]_hidden + (Y @ [Wm|Wl]_Y)   (Y part hoisted)
# ----------------------------------------------------------------------------
def vgae9_encoder_kernel(adj_ref, h0_ref, wmlh_ref, ywml_ref, hml_ref):
    hidden = jnp.maximum(
        jnp.dot(adj_ref[...], h0_ref[...], preferred_element_type=F32), 0.0)
    hml = (jnp.dot(hidden.astype(BF16), wmlh_ref[...],
                   preferred_element_type=F32)
           + ywml_ref[...])
    hml_ref[...] = hml.astype(hml_ref.dtype)          # bf16 for stage-2 MXU


# ----------------------------------------------------------------------------
# Kernel 2: decoder — one adj aggregation -> [mean | logstd], reparam, MLP.
# ----------------------------------------------------------------------------
def vgae9_decoder_kernel(adj_ref, hml_ref, noise_ref, yw1b_ref,
                         w1z_ref, w2_ref, b2_ref, out_ref):
    h2 = noise_ref.shape[-1]

    # single adj aggregation for BOTH mean and logstd
    agg = jnp.dot(adj_ref[...], hml_ref[...], preferred_element_type=F32)
    mean = agg[:, :h2]
    logstd = agg[:, h2:]

    # reparameterization (f32 elementwise — v5e-safe)
    z = noise_ref[...] * jnp.exp(logstd) + mean

    # fc1(cat([z, Y])) + relu; the Y@W1y + b1 part is precomputed (yw1b)
    z2 = jnp.maximum(
        jnp.dot(z.astype(BF16), w1z_ref[...], preferred_element_type=F32)
        + yw1b_ref[...], 0.0)

    # fc2 -> sigmoid; lane-dense (padded) store; sigmoid via one tanh EUP op
    logits = (jnp.dot(z2.astype(BF16), w2_ref[...], preferred_element_type=F32)
              + b2_ref[...])
    out_ref[...] = 0.5 * (jnp.tanh(0.5 * logits) + 1.0)


# ----------------------------------------------------------------------------
# Generation-aware VMEM budget and preferred row tile.
# ----------------------------------------------------------------------------
def _vmem_budget_and_tile():
    vmem_cap = 128 * 1024 * 1024
    try:
        info = pltpu.get_tpu_info()
        vmem_cap = getattr(info, "vmem_capacity_bytes", vmem_cap)
    except Exception:
        pass
    if vmem_cap <= 64 * 1024 * 1024:          # v7x: 64 MiB physical per TC
        return 48 * 1024 * 1024, 128
    return 96 * 1024 * 1024, 256              # v5e / v6e: 128 MiB physical


# ----------------------------------------------------------------------------
# Wrapper: parameter layout prep (hoisted matmuls, bf16 casts) + two
# row-tiled pallas_calls over a 1-D "parallel" grid.
# ----------------------------------------------------------------------------
def vgae9_forward(X, Y, adj, params, noise, *, tm=None):
    N, input_dim = X.shape
    num_class = Y.shape[1]
    W0 = params["W0"]            # (input_dim + num_class, hidden1)
    Wm = params["Wm"]            # (hidden1 + num_class, hidden2)
    Wl = params["Wl"]            # (hidden1 + num_class, hidden2)
    W1 = params["fc1_w"]         # (hidden1, hidden2 + num_class)  torch (out, in)
    b1 = params["fc1_b"]         # (hidden1,)
    W2 = params["fc2_w"]         # (N, hidden1)
    b2 = params["fc2_b"]         # (N,)

    hidden1 = W0.shape[1]
    hidden2 = Wm.shape[1]
    Npad = ((N + 127) // 128) * 128

    # --- tile selection ------------------------------------------------------
    vmem_limit, tm_pref = _vmem_budget_and_tile()
    tm = tm_pref if tm is None else tm
    tm = min(tm, N)
    # largest 8-aligned tile <= tm that divides N
    while tm > 8 and (N % tm != 0 or tm % 8 != 0):
        tm -= 8
    assert N % tm == 0 and tm % 8 == 0, \
        "N must be divisible by an 8-aligned row tile"

    # v7x megacore: make sure the 'parallel' grid axis has >= 2 steps
    if N // tm < 2 and N % 16 == 0:
        tm = N // 2

    # shrink tm if the stage-2 VMEM estimate would overrun the scoped budget
    def _stage2_vmem(tm_):
        return (2 * tm_ * N * 2                      # adj tile, bf16, dbl-buf
                + 2 * N * (2 * hidden2) * 2          # hml (resident)
                + 2 * tm_ * Npad * 4                 # f32 output tile
                + 2 * hidden1 * Npad * 2             # fc2 weight (padded)
                + 2 * tm_ * (hidden1 + 3 * hidden2) * 4)
    while tm >= 16 and (tm // 2) % 8 == 0 and \
            _stage2_vmem(tm) > int(0.75 * vmem_limit):
        tm //= 2

    grid = (N // tm,)

    # --- layout prep (done once, outside the grid loop) -----------------------
    adj_b = adj.astype(BF16)                                  # bf16 adj, cast once

    XY = jnp.concatenate([X, Y], axis=1)                      # fuse X|Y concat
    H0 = jnp.dot(XY, W0).astype(BF16)                         # (N, hidden1) hoisted

    Wml = jnp.concatenate([Wm, Wl], axis=1)                   # fuse mean/logstd
    Wml_h = Wml[:hidden1].astype(BF16)                        # (hidden1, 2*hidden2)
    YWml = jnp.dot(Y, Wml[hidden1:])                          # (N, 2*hidden2) f32 hoisted

    W1_t = W1.T                                               # (hidden2+num_class, hidden1)
    W1z = W1_t[:hidden2].astype(BF16)                         # (hidden2, hidden1)
    YW1b = jnp.dot(Y, W1_t[hidden2:]) + b1.reshape(1, -1)     # (N, hidden1) f32 hoisted

    # pad fc2 output columns to a multiple of 128 -> lane-dense stores
    W2p = jnp.pad(W2.T, ((0, 0), (0, Npad - N))).astype(BF16)   # (hidden1, Npad)
    b2p = jnp.pad(b2.reshape(1, -1), ((0, 0), (0, Npad - N)))   # (1, Npad) f32

    cparams = pltpu.CompilerParams(
        dimension_semantics=("parallel",),
        vmem_limit_bytes=vmem_limit,
    )

    # --- stage 1: encoder (row-tiled) -----------------------------------------
    hml = pl.pallas_call(
        vgae9_encoder_kernel,
        out_shape=jax.ShapeDtypeStruct((N, 2 * hidden2), BF16),
        grid_spec=pltpu.PrefetchScalarGridSpec(
            num_scalar_prefetch=0,
            grid=grid,
            in_specs=[
                pl.BlockSpec((tm, N), lambda i: (i, 0)),                  # adj row tile (bf16)
                pl.BlockSpec((N, hidden1), lambda i: (0, 0)),             # H0 (full, resident)
                pl.BlockSpec((hidden1, 2 * hidden2), lambda i: (0, 0)),   # [Wm|Wl] hidden part
                pl.BlockSpec((tm, 2 * hidden2), lambda i: (i, 0)),        # Y@[Wm|Wl]_Y row tile
            ],
            out_specs=pl.BlockSpec((tm, 2 * hidden2), lambda i: (i, 0)),
        ),
        compiler_params=cparams,
    )(adj_b, H0, Wml_h, YWml)

    # --- stage 2: decoder (row-tiled) ------------------------------------------
    out_pad = pl.pallas_call(
        vgae9_decoder_kernel,
        out_shape=jax.ShapeDtypeStruct((N, Npad), F32),
        grid_spec=pltpu.PrefetchScalarGridSpec(
            num_scalar_prefetch=0,
            grid=grid,
            in_specs=[
                pl.BlockSpec((tm, N), lambda i: (i, 0)),                  # adj row tile (bf16)
                pl.BlockSpec((N, 2 * hidden2), lambda i: (0, 0)),         # hml (full, resident)
                pl.BlockSpec((tm, hidden2), lambda i: (i, 0)),            # noise row tile
                pl.BlockSpec((tm, hidden1), lambda i: (i, 0)),            # Y@W1y + b1 row tile
                pl.BlockSpec((hidden2, hidden1), lambda i: (0, 0)),       # fc1 weight (z part)
                pl.BlockSpec((hidden1, Npad), lambda i: (0, 0)),          # fc2 weight (padded)
                pl.BlockSpec((1, Npad), lambda i: (0, 0)),                # fc2 bias (padded)
            ],
            out_specs=pl.BlockSpec((tm, Npad), lambda i: (i, 0)),
        ),
        compiler_params=cparams,
    )(adj_b, hml, noise, YW1b, W1z, W2p, b2p)

    return out_pad[:, :N]


# ----------------------------------------------------------------------------
# Deterministic parameter init (glorot for GCN weights, uniform for Linear)
# ----------------------------------------------------------------------------
def glorot_init(key, in_dim, out_dim):
    r = jnp.sqrt(6.0 / (in_dim + out_dim))
    return jax.random.uniform(key, (in_dim, out_dim), F32, -r, r)


def init_params(key, N, input_dim, hidden1, hidden2, num_class):
    ks = jax.random.split(key, 8)
    return {
        "W0": glorot_init(ks[0], input_dim + num_class, hidden1),
        "Wm": glorot_init(ks[1], hidden1 + num_class, hidden2),
        "Wl": glorot_init(ks[2], hidden1 + num_class, hidden2),
        # nn.Linear(hidden2 + num_class, hidden1)
        "fc1_w": jax.random.uniform(ks[3], (hidden1, hidden2 + num_class),
                                    F32, -0.1, 0.1),
        "fc1_b": jax.random.uniform(ks[4], (hidden1,), F32, -0.1, 0.1),
        # nn.Linear(hidden1, N)
        "fc2_w": jax.random.uniform(ks[5], (N, hidden1), F32, -0.1, 0.1),
        "fc2_b": jax.random.uniform(ks[6], (N,), F32, -0.1, 0.1),
    }


# ----------------------------------------------------------------------------
if __name__ == "__main__":
    N = 64            # number of graph nodes (adj is N x N)
    input_dim = 16
    hidden1 = 32
    hidden2 = 16
    num_class = 4

    key = jax.random.PRNGKey(0)
    k_x, k_y, k_adj, k_noise, k_params = jax.random.split(key, 5)

    X = jax.random.normal(k_x, (N, input_dim), F32)
    labels = jax.random.randint(k_y, (N,), 0, num_class)
    Y = jax.nn.one_hot(labels, num_class, dtype=F32)

    # symmetric row-normalized-ish dense adjacency
    A = (jax.random.uniform(k_adj, (N, N)) < 0.1).astype(F32)
    A = jnp.maximum(A, A.T) + jnp.eye(N, dtype=F32)
    deg = jnp.sum(A, axis=1, keepdims=True)
    adj = A / deg

    # gaussian_noise = torch.randn(N, hidden2) — pre-sampled deterministically here
    # TODO(synk): in-model torch.randn is replaced by host-side sampling (no in-kernel PRNG needed).
    noise = jax.random.normal(k_noise, (N, hidden2), F32)

    params = init_params(k_params, N, input_dim, hidden1, hidden2, num_class)

    A_pred = vgae9_forward(X, Y, adj, params, noise)
    A_pred = jax.block_until_ready(A_pred)

    assert A_pred.shape == (N, N)
    assert bool(jnp.all(jnp.isfinite(A_pred)))
    assert bool(jnp.all((A_pred >= 0.0) & (A_pred <= 1.0)))
    print("KERNEL_OK")
</pallas_src>

<mosaic_0001>
module attributes {stable_mosaic.version = 11 : i64} {
  func.func @vgae9_encoder_kernel(%arg0: i32, %arg1: memref<32x64xbf16, #tpu.memory_space<vmem>>, %arg2: memref<64x32xbf16, #tpu.memory_space<vmem>>, %arg3: memref<32x32xbf16, #tpu.memory_space<vmem>>, %arg4: memref<32x32xf32, #tpu.memory_space<vmem>>, %arg5: memref<32x32xbf16, #tpu.memory_space<vmem>>) attributes {dimension_semantics = [#tpu.dimension_semantics<parallel>], iteration_bounds = array<i64: 2>, scalar_prefetch = 0 : i64, scratch_operands = 0 : i64, tpu.core_type = #tpu.core_type<tc>, window_params = [{transform_indices = @transform_0, window_bounds = array<i64: 32, 64>}, {pipeline_mode = #tpu.pipeline_mode<synchronous>, transform_indices = @transform_1, window_bounds = array<i64: 64, 32>}, {pipeline_mode = #tpu.pipeline_mode<synchronous>, transform_indices = @transform_2, window_bounds = array<i64: 32, 32>}, {transform_indices = @transform_3, window_bounds = array<i64: 32, 32>}, {transform_indices = @transform_4, window_bounds = array<i64: 32, 32>}]} {
    %c0 = arith.constant 0 : index
    %c0_0 = arith.constant 0 : index
    %0 = vector.load %arg1[%c0, %c0_0] : memref<32x64xbf16, #tpu.memory_space<vmem>>, vector<32x64xbf16>
    %c0_1 = arith.constant 0 : index
    %c0_2 = arith.constant 0 : index
    %1 = vector.load %arg2[%c0_1, %c0_2] : memref<64x32xbf16, #tpu.memory_space<vmem>>, vector<64x32xbf16>
    %cst = arith.constant dense<0.000000e+00> : vector<32x32xf32>
    %2 = tpu.matmul %0, %1, %cst {dimension_numbers = #tpu.dot_dimension_numbers<[1], [0], [0], [1], [0, 0, 1, 1], [], []>} : vector<32x64xbf16>, vector<64x32xbf16>, vector<32x32xf32> -> vector<32x32xf32>
    %cst_3 = arith.constant 0.000000e+00 : f32
    %3 = vector.broadcast %cst_3 : f32 to vector<32x32xf32>
    %4 = arith.maximumf %2, %3 : vector<32x32xf32>
    %5 = arith.truncf %4 : vector<32x32xf32> to vector<32x32xbf16>
    %c0_4 = arith.constant 0 : index
    %c0_5 = arith.constant 0 : index
    %6 = vector.load %arg3[%c0_4, %c0_5] : memref<32x32xbf16, #tpu.memory_space<vmem>>, vector<32x32xbf16>
    %cst_6 = arith.constant dense<0.000000e+00> : vector<32x32xf32>
    %7 = tpu.matmul %5, %6, %cst_6 {dimension_numbers = #tpu.dot_dimension_numbers<[1], [0], [0], [1], [0, 0, 1, 1], [], []>} : vector<32x32xbf16>, vector<32x32xbf16>, vector<32x32xf32> -> vector<32x32xf32>
    %c0_7 = arith.constant 0 : index
    %c0_8 = arith.constant 0 : index
    %8 = vector.load %arg4[%c0_7, %c0_8] : memref<32x32xf32, #tpu.memory_space<vmem>>, vector<32x32xf32>
    %9 = arith.addf %7, %8 : vector<32x32xf32>
    %10 = arith.truncf %9 : vector<32x32xf32> to vector<32x32xbf16>
    %c0_9 = arith.constant 0 : index
    %c0_10 = arith.constant 0 : index
    %11 = vector.load %arg5[%c0_9, %c0_10] : memref<32x32xbf16, #tpu.memory_space<vmem>>, vector<32x32xbf16>
    tpu.vector_store %arg5[%c0_9, %c0_10], %10 {strides = array<i32>} : memref<32x32xbf16, #tpu.memory_space<vmem>>, vector<32x32xbf16>,
    return
  }
  func.func @transform_0(%arg0: i32) -> (i32, i32) {
    %c0_i32 = arith.constant 0 : i32
    %c0_i32_0 = arith.constant 0 : i32
    return %arg0, %c0_i32 : i32, i32
  }
  func.func @transform_1(%arg0: i32) -> (i32, i32) {
    %c0_i32 = arith.constant 0 : i32
    %c0_i32_0 = arith.constant 0 : i32
    %c0_i32_1 = arith.constant 0 : i32
    return %c0_i32, %c0_i32_0 : i32, i32
  }
  func.func @transform_2(%arg0: i32) -> (i32, i32) {
    %c0_i32 = arith.constant 0 : i32
    %c0_i32_0 = arith.constant 0 : i32
    %c0_i32_1 = arith.constant 0 : i32
    return %c0_i32, %c0_i32_0 : i32, i32
  }
  func.func @transform_3(%arg0: i32) -> (i32, i32) {
    %c0_i32 = arith.constant 0 : i32
    %c0_i32_0 = arith.constant 0 : i32
    return %arg0, %c0_i32 : i32, i32
  }
  func.func @transform_4(%arg0: i32) -> (i32, i32) {
    %c0_i32 = arith.constant 0 : i32
    %c0_i32_0 = arith.constant 0 : i32
    return %arg0, %c0_i32 : i32, i32
  }
}

</mosaic_0001>

<bundles_post_ra>
// kernel: tpu_custom_call.1
= control target key start
LH: loop header
LB: loop body
LE: loop exit
PB: predicated region body
PF: predicated region fallthrough
CT: control target
= control target key end

     0   :  { %9 = vsyncpa [#allocation3], 0  ;;  %s1307_s0 = inlined_call_operand.hbm [shape: bf16[64,64], index: 0, kind: input, shape index: {}]   ;;  %s1308_s1 = inlined_call_operand.hbm [shape: bf16[64,32], index: 1, kind: input, shape index: {}]   ;;  %s1309_s2 = inlined_call_operand.hbm [shape: bf16[32,32], index: 2, kind: input, shape index: {}]   ;;  %s1310_s3 = inlined_call_operand.hbm [shape: f32[64,32], index: 3, kind: input, shape index: {}]   ;;  %s1311_s4 = inlined_call_operand.hbm [shape: bf16[64,32], index: 4, kind: output, shape index: {}]  }
   0x1   :  { %11 = vsyncpa [#allocation3 + $0x1], 0 }
   0x2   :  { %12 = vsyncpa [#allocation6], 0 }
   0x3   :  { %13 = vsyncpa [#allocation9], 0 }
   0x4   :  { %15 = vsyncpa [#allocation9 + $0x1], 0 }
   0x5   :  { %16 = vsyncpa [#allocation4], 0 }
   0x6   :  { %18 = vsyncpa [#allocation4 + $0x1], 0  ;;  %s1012_s15 = smov 0   ;;  %s1014_s16 = smov 0  }
   0x7   :  { %s1016_s17 = smov 0   ;;  %s1018_s18 = smov 0  }
   0x8 LB: > { %s1033_s19 = sadd.s32 4294967295, %s974_s18   ;;  %s623_s20 = sadd.s32 4294967294, %s974_s18   ;;  %s974_s18 = sphi %s1018_s18, %s1337_s18   ;;  %s970_s17 = sphi %s1016_s17, %s1336_s17   ;;  %s966_s16 = sphi %s1014_s16, %s1335_s16   ;;  %s962_s15 = sphi %s1012_s15, %s1334_s15  }
   0x9   : > { %s1037_s21 = sadd.s32 1, %s974_s18   ;;  %s31_s22 = sadd.s32 1, %s970_s17 }
   0xa   : > { %s28_s23 = ssub.s32 %s974_s18, %s1037_s21  ;;  %p38_p0 = scmp.ne.s32.totalorder %s970_s17, %s966_s16 }
   0xb   : > { %p29_p1 = scmp.eq.s32.totalorder %s28_s23, 0  ;;  %p39_p2 = scmp.eq.s32.totalorder %s974_s18, 0 }
   0xc   : > { %p44_p3 = scmp.ne.s32.totalorder %s966_s16, %s962_s15  ;;  %p1312_p4 = scmp.eq.s32.totalorder %s1033_s19, 0 }
   0xd   : > { %s1049_s24 = scalar_select %p29_p1, %s970_s17, %s31_s22  }
   0xe   : > { %p1051_p5 = por %p39_p2, %p38_p0  ;;  %p1057_p6 = por %p1312_p4, %p44_p3 }
   0xf   : > { %1316 = sst [smem:[#allocation15_spill]] %s1049_s24  ;;  %p136_p7 = scmp.eq.s32.totalorder %s1033_s19, 1 }
  0x10   : > { %s1317_s25 = scalar_select %p1051_p5, 1, 0 }
  0x11   : > { %s1318_s26 = scalar_select %p1057_p6, 1, 0 }
  0x12   : > { %p142_p8 = scmp.eq.s32.totalorder %s623_s20, 1  ;;  %p624_p9 = scmp.ge.s32.totalorder %s974_s18, 1 }
  0x13   : > { %p149_p10 = scmp.lt.s32.totalorder %s974_s18, 3  ;;  %p1064_p11 = por %p136_p7, %p38_p0 }
  0x14   : > { %p1068_p12 = por %p142_p8, %p44_p3  ;;  %s976_s30 = smov [#allocation5]  }
  0x15   : > { %s1319_s27 = scalar_select %p1064_p11, 1, 0 }
  0x16   : > { %s1320_s28 = scalar_select %p1068_p12, 1, 0 }
  0x17   : > { %p1072_p13 = pnand %p624_p9, %p149_p10  ;;  %s161_s5 = sshll.u32 %s976_s30, 4  ;;  %s162_s5 = int_to_ptr.vmem [resolvable:$true] %s161_s5 }
  0x18   : > { %s977_s7 = smov [#allocation7]   ;;  %s784_s11 = scalar_lea.hbm %s1308_s1, 512 }
  0x19   : > { %s1321_s29 = scalar_select %p1072_p13, 1, 0 }
  0x1a   : > { %p712_p1 = pneg %p1072_p13  ;;  %s174_s8 = sshll.u32 %s977_s7, 4  ;;  %s175_s8 = int_to_ptr.vmem [resolvable:$true] %s174_s8 }
  0x1b   : > { %p785_p7 = scmp.ne.s32.totalorder %s1308_s1, %s784_s11 }
  0x1c   : > { %p1080_p2 = pnand %p712_p1, %p1312_p4  ;;  %p791_p1 = scmp.lt.u32.totalorder %s784_s11, %s1308_s1 }
  0x1e   : > { %p786_p8 = pneg %p1080_p2 }
  0x20   : > { %p787_p9 = pnand %p786_p8, %p785_p7 }
  0x22   : > { %p788_p10 = pneg %p787_p9 }
  0x24   : > { %p793_p0 = pnand %p791_p1, %p788_p10 }
  0x26   : > { %796 = shalt.err (!%p793_p0)
}
  0x27   : > { %s797_s22 = scalar_lea.vmem %s162_s5, 512  ;;  %p805_p11 = scmp.lt.s32.totalorder %s162_s5, %s162_s5 }
  0x28   : > { %p798_p4 = scmp.ne.s32.totalorder %s162_s5, %s797_s22  ;;  %p806_p6 = scmp.lt.s32.totalorder %s797_s22, %s797_s22 }
  0x2a   : > { %p800_p3 = pnand %p798_p4, %p786_p8  ;;  %p807_p13 = por %p806_p6, %p805_p11 }
  0x2c   : > { %p801_p12 = pneg %p800_p3 }
  0x2e   : > { %p808_p5 = pnand %p807_p13, %p801_p12 }
  0x30   : > { %811 = shalt.err (!%p808_p5)
}
  0x31   : > { %s978_s23 = smov 64   ;;  %s979_s30 = smov 4  }
  0x32   : > { %715 = dma.hbm_to_vmem [thread:$0]  (!%p1080_p2), %s1308_s1, 512, %s162_s5, [#allocation6], %s978_s23, %s978_s23, %s979_s30  }
  0x33   : > { %s1112_s10 = sand.u32 1, %s970_s17   ;;  %s812_s13 = scalar_lea.hbm %s1309_s2, 256 }
  0x34   : > { %p813_p4 = scmp.ne.s32.totalorder %s1309_s2, %s812_s13  ;;  %p819_p11 = scmp.lt.u32.totalorder %s812_s13, %s1309_s2 }
  0x36   : > { %p815_p5 = pnand %p813_p4, %p786_p8 }
  0x38   : > { %p816_p6 = pneg %p815_p5 }
  0x3a   : > { %p821_p12 = pnand %p819_p11, %p816_p6 }
  0x3c   : > { %824 = shalt.err (!%p821_p12)
}
  0x3d   : > { %s825_s5 = scalar_lea.vmem %s175_s8, 256  ;;  %p833_p7 = scmp.lt.s32.totalorder %s175_s8, %s175_s8 }
  0x3e   : > { %p826_p13 = scmp.ne.s32.totalorder %s175_s8, %s825_s5  ;;  %p834_p9 = scmp.lt.s32.totalorder %s825_s5, %s825_s5 }
  0x40   : > { %p828_p0 = pnand %p826_p13, %p786_p8  ;;  %p835_p10 = por %p834_p9, %p833_p7 }
  0x42   : > { %p829_p3 = pneg %p828_p0 }
  0x44   : > { %p836_p1 = pnand %p835_p10, %p829_p3 }
  0x46   : > { %839 = shalt.err (!%p836_p1)
}
  0x47   : > { %718 = dma.hbm_to_vmem [thread:$0]  (!%p1080_p2), %s1309_s2, 256, %s175_s8, [#allocation6], %s978_s23, %s978_s23, %s979_s30  }
  0x48   : > { %s628_s9 = sshll.u32 %s1112_s10, 4  ;;  %s661_s11 = sshll.u32 %s974_s18, 8 }
  0x49   : > { %s1142_s14 = scalar_lea.hbm %s1307_s0, %s661_s11  ;;  %s192_s6 = scalar_lea.vmem [#allocation2], %s628_s9 }
  0x4a   : > { %s199_s20 = sshll.u32 %s192_s6, 4  ;;  %p1323_p8 = scmp.ne.s32.totalorder %s1317_s25, 0  ;;  %s1144_s20 = int_to_ptr.vmem [resolvable:$true] %s199_s20 }
  0x4b   : > { %p1324_p4 = scmp.lt.s32.totalorder %s974_s18, 2  ;;  %s631_s8 = sshll.u32 %s1112_s10, 5 }
  0x4c   : > { %s189_s5 = scalar_lea.sflag [#allocation3], %s1112_s10  ;;  %s840_s24 = scalar_lea.hbm %s1142_s14, 256 }
  0x4d   : > { %p1150_p5 = pnand %p1324_p4, %p1323_p8  ;;  %p841_p2 = scmp.ne.s32.totalorder %s1142_s14, %s840_s24 }
  0x4e   : > { %s845_s25 = scalar_lea.hbm %s1307_s0, 512  ;;  %p846_p13 = scmp.lt.u32.totalorder %s1142_s14, %s1307_s0 }
  0x4f   : > { %p842_p6 = pneg %p1150_p5  ;;  %p847_p0 = scmp.lt.u32.totalorder %s845_s25, %s840_s24 }
  0x50   : > { %p849_p7 = scmp.lt.u32.totalorder %s840_s24, %s1142_s14 }
  0x51   : > { %p843_p11 = pnand %p842_p6, %p841_p2  ;;  %p848_p3 = por %p847_p0, %p846_p13 }
  0x53   : > { %p844_p12 = pneg %p843_p11  ;;  %p850_p9 = por %p849_p7, %p848_p3 }
  0x55   : > { %p851_p10 = pnand %p850_p9, %p844_p12 }
  0x57   : > { %854 = shalt.err (!%p851_p10)
}
  0x58   : > { %s855_s13 = scalar_lea.vmem %s1144_s20, 256  ;;  %s980_s6 = smov [#allocation2]  }
  0x59   : > { %p856_p1 = scmp.ne.s32.totalorder %s1144_s20, %s855_s13  ;;  %s860_s7 = sshll.u32 %s980_s6, 4  ;;  %s861_s7 = int_to_ptr.vmem [resolvable:$false] %s860_s7 }
  0x5a   : > { %s862_s9 = scalar_lea.vmem %s861_s7, 512  ;;  %p863_p2 = scmp.lt.s32.totalorder %s1144_s20, %s861_s7 }
  0x5b   : > { %p858_p8 = pnand %p856_p1, %p842_p6  ;;  %p864_p11 = scmp.lt.s32.totalorder %s862_s9, %s855_s13 }
  0x5d   : > { %p859_p4 = pneg %p858_p8  ;;  %p865_p13 = por %p864_p11, %p863_p2 }
  0x5f   : > { %p866_p0 = pnand %p865_p13, %p859_p4 }
  0x61   : > { %869 = shalt.err (!%p866_p0)
}
  0x62   : > { %722 = dma.hbm_to_vmem [thread:$0]  (!%p1150_p5), %s1142_s14, 256, %s1144_s20, %s189_s5, %s978_s23, %s978_s23, %s979_s30  }
  0x63   : > { %s662_s24 = sshll.u32 %s974_s18, 9  ;;  %s213_s25 = scalar_lea.vmem [#allocation8], %s631_s8 }
  0x64   : > { %s220_s11 = sshll.u32 %s213_s25, 4  ;;  %s1192_s6 = scalar_lea.hbm %s1310_s3, %s662_s24  ;;  %s1194_s11 = int_to_ptr.vmem [resolvable:$true] %s220_s11 }
  0x65   : > { %s210_s7 = scalar_lea.sflag [#allocation9], %s1112_s10  ;;  %s870_s9 = scalar_lea.hbm %s1192_s6, 512 }
  0x66   : > { %p871_p12 = scmp.ne.s32.totalorder %s1192_s6, %s870_s9  ;;  %s875_s14 = scalar_lea.hbm %s1310_s3, 1024 }
  0x67   : > { %p876_p9 = scmp.lt.u32.totalorder %s1192_s6, %s1310_s3  ;;  %p877_p10 = scmp.lt.u32.totalorder %s875_s14, %s870_s9 }
  0x68   : > { %p873_p3 = pnand %p871_p12, %p842_p6  ;;  %p879_p8 = scmp.lt.u32.totalorder %s870_s9, %s1192_s6 }
  0x69   : > { %p878_p1 = por %p877_p10, %p876_p9 }
  0x6a   : > { %p874_p7 = pneg %p873_p3 }
  0x6b   : > { %p880_p4 = por %p879_p8, %p878_p1 }
  0x6d   : > { %p881_p2 = pnand %p880_p4, %p874_p7 }
  0x6f   : > { %884 = shalt.err (!%p881_p2)
}
  0x70   : > { %s885_s5 = scalar_lea.vmem %s1194_s11, 512  ;;  %s981_s24 = smov [#allocation8]  }
  0x71   : > { %p886_p11 = scmp.ne.s32.totalorder %s1194_s11, %s885_s5  ;;  %s890_s25 = sshll.u32 %s981_s24, 4  ;;  %s891_s25 = int_to_ptr.vmem [resolvable:$false] %s890_s25 }
  0x72   : > { %s892_s12 = scalar_lea.vmem %s891_s25, 1024  ;;  %p893_p12 = scmp.lt.s32.totalorder %s1194_s11, %s891_s25 }
  0x73   : > { %p888_p13 = pnand %p886_p11, %p842_p6  ;;  %p894_p3 = scmp.lt.s32.totalorder %s892_s12, %s885_s5 }
  0x75   : > { %p889_p0 = pneg %p888_p13  ;;  %p895_p9 = por %p894_p3, %p893_p12 }
  0x77   : > { %p896_p10 = pnand %p895_p9, %p889_p0 }
  0x79   : > { %899 = shalt.err (!%p896_p10)
}
  0x7a   : > { %s982_s13 = smov 128   ;;  %s983_s9 = smov 8  }
  0x7b   : > { %725 = dma.hbm_to_vmem [thread:$0]  (!%p1150_p5), %s1192_s6, 512, %s1194_s11, %s210_s7, %s982_s13, %s982_s13, %s983_s9  }
  0x7c   : > { %p1326_p6 = scmp.ne.s32.totalorder %s1321_s29, 0 }
  0x7d   : > { %s1225_s23 = sand.u32 (!%p1326_p6), 1, %s966_s16   ;;  %p1327_p7 = scmp.ne.s32.totalorder (!%p1326_p6), %s1318_s26, 0 }
  0x7e   : > { %232 = sbr.rel (%p1326_p6) target bundleno = 611 (0x263), region = 36  ;;  %s635_s30 = sshll.u32 (!%p1326_p6), %s1225_s23, 4 }
  0x7f   : > { %s235_s14 = scalar_lea.sflag (!%p1326_p6), [#allocation3], %s1225_s23  ;;  %s238_s20 = scalar_lea.vmem (!%p1326_p6), [#allocation2], %s635_s30 }
  0x85   : > { %945 = dma.done.wait (%p1327_p7), %s235_s14, 256  }
  0x86   : > { %947 = vsyncadd (%p1327_p7), %s235_s14, 4294967040  ;;  %p1328_p5 = scmp.eq.s32.totalorder %s1033_s19, 0 }
  0x88   : > { %949 = dma.done.wait (%p1328_p5), [#allocation6], 768   ;;  %p1329_p1 = pmov %p1328_p5 }
  0x89   : > { %s638_s29 = sshll.u32 %s1225_s23, 5  ;;  %s252_s10 = scalar_lea.sflag [#allocation9], %s1225_s23 }
  0x8a   : > { %951 = vsyncadd (%p1329_p1), [#allocation6], 4294966528  ;;  %s1241_s22 = scalar_lea.vmem [#allocation8], %s638_s29 }
  0x8b   : > { %953 = dma.done.wait (%p1327_p7), %s252_s10, 512  }
  0x8c   : > { %955 = vsyncadd (%p1327_p7), %s252_s10, 4294966784  ;;  %v776_v0 = vld [vmem:[#allocation5] sm:$0xff]   ;;  %v777_v1 = vld [vmem:[#allocation5 + $0x8] sm:$0xff]   ;;  %vm335_vm0 = vcmask 523264   ;;  %vm417_vm1 = vcmask 261120   ;;  %s284_s26 = scalar_lea.vmem [#allocation10], %s635_s30 }
  0x8d   : > { %678 = vmatprep.subr.bf16.mxu0 %v776_v0  ;;  %v778_v2 = vld [vmem:[#allocation5 + $0x10] sm:$0xff]   ;;  %v779_v4 = vld [vmem:[#allocation5 + $0x18] sm:$0xff]   ;;  %v782_v6 = vld [vmem:[#allocation7] sm:$0xff]   ;;  %s508_s11 = sshll.u32 %s284_s26, 4  ;;  %vm489_vm2 = vcmask 257024   ;;  %s667_s6 = sshll.u32 %s1033_s19, 8  ;;  %s1254_s11 = int_to_ptr.vmem [resolvable:$true] %s508_s11 }
  0x8e   : > { %679 = vmatpush3.bf16.msra.mxu0 %v776_v0  ;;  %v780_v3 = vld [vmem:[%s238_s20] sm:$0xff]   ;;  %v781_v5 = vld [vmem:[%s238_s20 + $0x8] sm:$0xff]   ;;  %690 = vmatprep.subr.bf16.mxu1 %v782_v6  ;;  %s1260_s5 = scalar_lea.hbm %s1311_s4, %s667_s6  ;;  %s495_s19 = scalar_lea.sflag [#allocation4], %s1225_s23 }
  0x8f   : > { %680 = vmatprep.subr.bf16.mxu0 %v777_v1  ;;  %686 = vmatprep.mubr.msk.bf16.mxu0 %vm335_vm0, %v780_v3  ;;  %v783_v7 = vld [vmem:[#allocation7 + $0x8] sm:$0xff]   ;;  %v403_v18 = vld [vmem:[%s1241_s22 + $0x10] sm:$0xff]  ;;  %v401_v19 = vld [vmem:[%s1241_s22] sm:$0xff]  ;;  %s900_s24 = scalar_lea.vmem %s1254_s11, 256  ;;  %p1330_p4 = scmp.ne.s32.totalorder %s1319_s27, 0 }
  0x90   : > { %691 = vmatpush3.bf16.msra.mxu1 %v782_v6  ;;  %v404_v21 = vld [vmem:[%s1241_s22 + $0x18] sm:$0xff]  ;;  %v402_v24 = vld [vmem:[%s1241_s22 + $0x8] sm:$0xff]  ;;  %p901_p8 = scmp.ne.s32.totalorder %s1254_s11, %s900_s24  ;;  %s984_s25 = smov [#allocation10]  }
  0x91   : > { %692 = vmatprep.subr.bf16.mxu1 %v783_v7  ;;  %s904_s12 = sshll.u32 %s984_s25, 4  ;;  %s905_s12 = int_to_ptr.vmem [resolvable:$false] %s904_s12 }
  0x92   : > { %681 = vmatpush3.bf16.msra.mxu0 %v777_v1  ;;  %p902_p2 = pnand %p901_p8, %p1330_p4  ;;  %s906_s13 = scalar_lea.vmem %s905_s12, 512 }
  0x93   : > { %682 = vmatprep.subr.bf16.mxu0 %v778_v2  ;;  %p907_p13 = scmp.lt.s32.totalorder %s1254_s11, %s905_s12  ;;  %p908_p0 = scmp.lt.s32.totalorder %s906_s13, %s900_s24 }
  0x94   : > { %693 = vmatpush3.bf16.msra.mxu1 %v783_v7  ;;  %p903_p11 = pneg %p902_p2 }
  0x95   : > { %p909_p12 = por %p908_p0, %p907_p13 }
  0x96   : > { %683 = vmatpush3.bf16.msra.mxu0 %v778_v2 }
  0x97   : > { %684 = vmatprep.subr.bf16.mxu0 %v779_v4  ;;  %p910_p3 = pnand %p909_p12, %p903_p11 }
  0x9a   : > { %685 = vmatpush3.bf16.msra.mxu0 %v779_v4 }
  0x9d   : > { %687 = vmatmul.mubr.msk.bf16.vlgmr.msra.gmra.mrb[0].mxu0 %vm335_vm0, %v781_v5 }
 0x170   : > { %v688_v8 = vpop.f32.mrb[0].mxu0 }
 0x171   : > { %v376_v9 = vpop.f32.mrb[1].mxu0  ;;  %v393_v11 = vmax.f32 %v688_v8, 0.0 }
 0x172   : > { %v689_v10 = vpop.f32.mrb[2].mxu0  ;;  %v391_v14 = vmax.f32 %v376_v9, 0.0 }
 0x173   : > { %v394_v12 = vmax.f32 %v689_v10, 0.0  ;;  %v379_v13 = vpop.f32.mrb[3].mxu0 }
 0x174   : > { %v392_v15 = vmax.f32 %v379_v13, 0.0 }
 0x175   : > { %v396_v16 = vpack.c.bf16 %v394_v12, %v393_v11 }
 0x176   : > { %v395_v17 = vpack.c.bf16 %v392_v15, %v391_v14 }
 0x178   : > { %694 = vmatprep.mubr.msk.bf16.mxu1 %vm417_vm1, %v395_v17 }
 0x179   : > { %695 = vmatmul.mubr.msk.bf16.vlgmr.msra.gmra.mrb[0].mxu1 %vm417_vm1, %v396_v16 }
 0x24c   : > { %v696_v20 = vpop.f32.mrb[0].mxu1 }
 0x24d   : > { %v467_v22 = vadd.f32 %v696_v20, %v403_v18  ;;  %v458_v23 = vpop.f32.mrb[1].mxu1 }
 0x24e   : > { %v459_v25 = vadd.f32 %v458_v23, %v401_v19  ;;  %v697_v26 = vpop.f32.mrb[2].mxu1 }
 0x24f   : > { %v665_v27 = vpack.c.bf16 %v467_v22, %v467_v22  ;;  %v470_v28 = vadd.f32 %v697_v26, %v404_v21  ;;  %v461_v29 = vpop.f32.mrb[3].mxu1 }
 0x250   : > { %v663_v30 = vpack.c.bf16 %v459_v25, %v459_v25  ;;  %v462_v31 = vadd.f32 %v461_v29, %v402_v24 }
 0x251   : > { %492 = vst.msk [vmem:[%s284_s26 + $0x8] sm:$0xf] %vm489_vm2, %v665_v27  ;;  %v666_v32 = vpack.c.bf16 %v470_v28, %v470_v28 }
 0x252   : > { %490 = vst.msk [vmem:[%s284_s26] sm:$0xf] %vm489_vm2, %v663_v30  ;;  %v664_v33 = vpack.c.bf16 %v462_v31, %v462_v31 }
 0x253   : > { %493 = vst.msk [vmem:[%s284_s26 + $0xc] sm:$0xf] %vm489_vm2, %v666_v32 }
 0x254   : > { %491 = vst.msk [vmem:[%s284_s26 + $0x4] sm:$0xf] %vm489_vm2, %v664_v33 }
 0x255   : > { %913 = shalt.err (!%p910_p3)
}
 0x256   : > { %s914_s9 = scalar_lea.hbm %s1260_s5, 256  ;;  %s918_s20 = scalar_lea.hbm %s1311_s4, 512 }
 0x257   : > { %p915_p9 = scmp.ne.s32.totalorder %s1260_s5, %s914_s9  ;;  %p919_p7 = scmp.lt.u32.totalorder %s1260_s5, %s1311_s4 }
 0x258   : > { %p920_p5 = scmp.lt.u32.totalorder %s918_s20, %s914_s9  ;;  %p922_p8 = scmp.lt.u32.totalorder %s914_s9, %s1260_s5 }
 0x259   : > { %p916_p10 = pnand %p915_p9, %p1330_p4 }
 0x25a   : > { %p921_p1 = por %p920_p5, %p919_p7 }
 0x25b   : > { %p917_p6 = pneg %p916_p10 }
 0x25c   : > { %p923_p2 = por %p922_p8, %p921_p1 }
 0x25e   : > { %p924_p11 = pnand %p923_p2, %p917_p6 }
 0x260   : > { %927 = shalt.err (!%p924_p11)
}
 0x261   : > { %s985_s22 = smov 64   ;;  %s986_s26 = smov 4  }
 0x262   : > { %710 = dma.vmem_to_hbm [thread:$0]  (%p1330_p4), %s1254_s11, 256, %s1260_s5, %s495_s19, %s985_s22, %s985_s22, %s986_s26  }
 0x263 PF: > { %s523_s6 = sand.u32 1, %s962_s15   ;;  %p1331_p13 = scmp.ne.s32.totalorder %s1320_s28, 0 }
 0x264   : > { %p1332_p0 = scmp.ge.s32.totalorder %s974_s18, 2  ;;  %s524_s7 = scalar_lea.sflag [#allocation4], %s523_s6 }
 0x266   : > { %p727_p12 = pnand %p1332_p0, %p1331_p13 }
 0x268   : > { %957 = dma.done.wait (!%p727_p12), %s524_s7, 256  }
 0x269   : > { %959 = vsyncadd (!%p727_p12), %s524_s7, 4294967040  ;;  %s1333_s8 = sld [smem:[#allocation15_spill]]  ;;  %p21_p3 = scmp.ge.s32.totalorder %s1037_s21, 4  }
 0x26a   : > { %s1334_s15 = smov %s966_s16  ;;  %s1335_s16 = smov %s970_s17 }
 0x26b   : > { %s1337_s18 = smov %s1037_s21  ;;  %23 = sbr.rel (!%p21_p3) target bundleno = 8 (0x8), region = 102 }
 0x26f   : > { %s1336_s17 = smov %s1333_s8 }
 0x272   :  { %529 = vsyncpa [#allocation3], 1 }
 0x273   :  { %531 = vsyncpa [#allocation3 + $0x1], 1 }
 0x274   :  { %532 = vsyncpa [#allocation6], 1 }
 0x275   :  { %533 = vsyncpa [#allocation9], 1 }
 0x276   :  { %535 = vsyncpa [#allocation9 + $0x1], 1 }
 0x277   :  { %536 = vsyncpa [#allocation4], 1 }
 0x278   :  { %538 = vsyncpa [#allocation4 + $0x1], 1 }

</bundles_post_ra>
